<compile_context>
chip_gen: v7x
topology: tpu7x:2x2x1
jax: 0.10.0
libtpu: 0.0.40
codegen_flags: <defaults>
</compile_context>

<pallas_src>
import functools

import jax
import jax.numpy as jnp
from jax.experimental import pallas as pl
from jax.experimental.pallas import tpu as pltpu

HIDDEN1 = 256
HIDDEN2 = 512
LANE = 128          # lane width: keep output last dim a multiple of this
SUBLANE = 8         # sublane granularity for the batch tile


def _round_up(x, m):
    return (x + m - 1) // m * m


def _generator_kernel(z_ref, w1_ref, b1_ref, w2_ref, b2_ref, w3_ref, b3_ref, o_ref):
    # Layer 1: Linear(input_dim, 256) + ReLU  (bf16 MXU operands, f32 accumulate)
    h1 = jnp.dot(z_ref[...], w1_ref[...], preferred_element_type=jnp.float32)
    h1 = jnp.maximum(h1 + b1_ref[...], 0.0)
    # Layer 2: Linear(256, 512) + ReLU
    h2 = jnp.dot(h1.astype(jnp.bfloat16), w2_ref[...],
                 preferred_element_type=jnp.float32)
    h2 = jnp.maximum(h2 + b2_ref[...], 0.0)
    # Layer 3: Linear(512, out_pad) + Tanh   (out_pad is lane-dense, >=128)
    h3 = jnp.dot(h2.astype(jnp.bfloat16), w3_ref[...],
                 preferred_element_type=jnp.float32)
    o_ref[...] = jnp.tanh(h3 + b3_ref[...]).astype(o_ref.dtype)


@functools.partial(jax.jit, static_argnames=("block_m",))
def generator_forward(z, params, block_m=512):
    """Run the Generator MLP on z of shape (B, input_dim). Returns (B, output_dim) f32."""
    w1, b1, w2, b2, w3, b3 = params
    B, in_dim = z.shape
    out_dim = w3.shape[1]
    out_pad = _round_up(out_dim, LANE)

    # Batch tile: as large as requested, but never bigger than the (sublane-
    # rounded) batch so small batches don't pad to a huge tile. For multi-TC
    # chips (v7x) callers should keep B / block_m >= 2 so "parallel" shards.
    bm = max(SUBLANE, min(block_m, _round_up(B, SUBLANE)))
    grid = (pl.cdiv(B, bm),)

    # bf16 MXU operands (halves weight DMA/VMEM, ~2x MXU throughput); biases f32.
    z_bf = z.astype(jnp.bfloat16)
    w1_bf = w1.astype(jnp.bfloat16)
    w2_bf = w2.astype(jnp.bfloat16)
    # Zero-pad last layer to a lane-dense width; padded cols give tanh(0)=0 and
    # are sliced away below.
    w3_bf = jnp.pad(w3, ((0, 0), (0, out_pad - out_dim))).astype(jnp.bfloat16)
    b3_pad = jnp.pad(b3, ((0, 0), (0, out_pad - out_dim)))

    # Weights/biases: single full-array blocks with constant index maps ->
    # resident in VMEM across the whole grid (no per-step re-DMA).
    full = lambda shape: pl.BlockSpec(shape, lambda i: (0, 0))

    flops = 2 * B * (in_dim * HIDDEN1 + HIDDEN1 * HIDDEN2 + HIDDEN2 * out_pad)
    bytes_accessed = (
        B * in_dim * 2                             # z (bf16)
        + (in_dim * HIDDEN1 + HIDDEN1 * HIDDEN2 + HIDDEN2 * out_pad) * 2  # weights (bf16)
        + (HIDDEN1 + HIDDEN2 + out_pad) * 4        # biases (f32)
        + B * out_pad * 4                          # output (f32)
    )
    cost = pl.CostEstimate(flops=flops,
                           transcendentals=B * out_pad,
                           bytes_accessed=bytes_accessed)

    out_padded = pl.pallas_call(
        _generator_kernel,
        out_shape=jax.ShapeDtypeStruct((B, out_pad), jnp.float32),
        grid_spec=pltpu.PrefetchScalarGridSpec(
            num_scalar_prefetch=0,
            grid=grid,
            in_specs=[
                pl.BlockSpec((bm, in_dim), lambda i: (i, 0)),   # z tile (bf16)
                full((in_dim, HIDDEN1)),                        # W1 (bf16)
                full((1, HIDDEN1)),                             # b1 (f32)
                full((HIDDEN1, HIDDEN2)),                       # W2 (bf16)
                full((1, HIDDEN2)),                             # b2 (f32)
                full((HIDDEN2, out_pad)),                       # W3 (bf16, padded)
                full((1, out_pad)),                             # b3 (f32, padded)
            ],
            out_specs=pl.BlockSpec((bm, out_pad), lambda i: (i, 0)),
        ),
        compiler_params=pltpu.CompilerParams(
            dimension_semantics=("parallel",),
            vmem_limit_bytes=32 * 1024 * 1024,   # safe on v7x (64 MiB physical)
        ),
        cost_estimate=cost,
    )(z_bf, w1_bf, b1, w2_bf, b2, w3_bf, b3_pad)

    return out_padded[:, :out_dim]


def init_generator_params(key, input_dim, output_dim):
    """Deterministic init mimicking PyTorch nn.Linear default (U[-1/sqrt(fan_in), 1/sqrt(fan_in)])."""
    dims = [(input_dim, HIDDEN1), (HIDDEN1, HIDDEN2), (HIDDEN2, output_dim)]
    params = []
    for (fan_in, fan_out) in dims:
        key, kw, kb = jax.random.split(key, 3)
        bound = 1.0 / (fan_in ** 0.5)
        # Stored as (in, out): already the transpose of PyTorch's (out, in) weight.
        w = jax.random.uniform(kw, (fan_in, fan_out), jnp.float32, -bound, bound)
        b = jax.random.uniform(kb, (1, fan_out), jnp.float32, -bound, bound)
        params += [w, b]
    return tuple(params)


def generator_reference_bf16(z, params):
    """Reference matching the kernel's bf16-operand / f32-accumulate numerics."""
    w1, b1, w2, b2, w3, b3 = params
    up = lambda a: a.astype(jnp.bfloat16).astype(jnp.float32)
    h = jnp.maximum(up(z) @ up(w1) + b1, 0.0)
    h = jnp.maximum(up(h) @ up(w2) + b2, 0.0)
    return jnp.tanh(up(h) @ up(w3) + b3)


def generator_reference_f32(z, params):
    w1, b1, w2, b2, w3, b3 = params
    h = jnp.maximum(z @ w1 + b1, 0.0)
    h = jnp.maximum(h @ w2 + b2, 0.0)
    return jnp.tanh(h @ w3 + b3)


if __name__ == "__main__":
    input_dim = 32    # latent dim
    output_dim = 64   # generated sample dim
    batch = 8

    key = jax.random.PRNGKey(0)
    k_z, k_p = jax.random.split(key)
    z = jax.random.normal(k_z, (batch, input_dim), jnp.float32)
    params = init_generator_params(k_p, input_dim, output_dim)

    out = generator_forward(z, params)
    out = jax.block_until_ready(out)
    assert out.shape == (batch, output_dim)

    # Tight check against a reference that uses the same bf16 matmul operands.
    ref_bf16 = generator_reference_bf16(z, params)
    assert jnp.allclose(out, ref_bf16, atol=2e-3, rtol=2e-3), "mismatch vs bf16 reference"

    # Loose sanity check against the pure-f32 reference (bf16 weight quantization).
    ref_f32 = generator_reference_f32(z, params)
    assert jnp.allclose(out, ref_f32, atol=5e-2, rtol=5e-2), "mismatch vs f32 reference"

    print("KERNEL_OK")
</pallas_src>

<mosaic_0001>
module attributes {stable_mosaic.version = 11 : i64} {
  func.func @_generator_kernel(%arg0: i32, %arg1: memref<8x32xbf16, #tpu.memory_space<vmem>>, %arg2: memref<32x256xbf16, #tpu.memory_space<vmem>>, %arg3: memref<1x256xf32, #tpu.memory_space<vmem>>, %arg4: memref<256x512xbf16, #tpu.memory_space<vmem>>, %arg5: memref<1x512xf32, #tpu.memory_space<vmem>>, %arg6: memref<512x128xbf16, #tpu.memory_space<vmem>>, %arg7: memref<1x128xf32, #tpu.memory_space<vmem>>, %arg8: memref<8x128xf32, #tpu.memory_space<vmem>>) attributes {dimension_semantics = [#tpu.dimension_semantics<parallel>], iteration_bounds = array<i64: 1>, scalar_prefetch = 0 : i64, scratch_operands = 0 : i64, tpu.core_type = #tpu.core_type<tc>, window_params = [{transform_indices = @transform_0, window_bounds = array<i64: 8, 32>}, {pipeline_mode = #tpu.pipeline_mode<synchronous>, transform_indices = @transform_1, window_bounds = array<i64: 32, 256>}, {pipeline_mode = #tpu.pipeline_mode<synchronous>, transform_indices = @transform_2, window_bounds = array<i64: 1, 256>}, {pipeline_mode = #tpu.pipeline_mode<synchronous>, transform_indices = @transform_3, window_bounds = array<i64: 256, 512>}, {pipeline_mode = #tpu.pipeline_mode<synchronous>, transform_indices = @transform_4, window_bounds = array<i64: 1, 512>}, {pipeline_mode = #tpu.pipeline_mode<synchronous>, transform_indices = @transform_5, window_bounds = array<i64: 512, 128>}, {pipeline_mode = #tpu.pipeline_mode<synchronous>, transform_indices = @transform_6, window_bounds = array<i64: 1, 128>}, {transform_indices = @transform_7, window_bounds = array<i64: 8, 128>}]} {
    %c0 = arith.constant 0 : index
    %c0_0 = arith.constant 0 : index
    %0 = vector.load %arg1[%c0, %c0_0] : memref<8x32xbf16, #tpu.memory_space<vmem>>, vector<8x32xbf16>
    %c0_1 = arith.constant 0 : index
    %c0_2 = arith.constant 0 : index
    %1 = vector.load %arg2[%c0_1, %c0_2] : memref<32x256xbf16, #tpu.memory_space<vmem>>, vector<32x256xbf16>
    %cst = arith.constant dense<0.000000e+00> : vector<8x256xf32>
    %2 = tpu.matmul %0, %1, %cst {dimension_numbers = #tpu.dot_dimension_numbers<[1], [0], [0], [1], [0, 0, 1, 1], [], []>} : vector<8x32xbf16>, vector<32x256xbf16>, vector<8x256xf32> -> vector<8x256xf32>
    %c0_3 = arith.constant 0 : index
    %c0_4 = arith.constant 0 : index
    %3 = vector.load %arg3[%c0_3, %c0_4] : memref<1x256xf32, #tpu.memory_space<vmem>>, vector<1x256xf32>
    %4 = vector.broadcast %3 : vector<1x256xf32> to vector<8x256xf32>
    %5 = arith.addf %2, %4 : vector<8x256xf32>
    %cst_5 = arith.constant 0.000000e+00 : f32
    %6 = vector.broadcast %cst_5 : f32 to vector<8x256xf32>
    %7 = arith.maximumf %5, %6 : vector<8x256xf32>
    %8 = arith.truncf %7 : vector<8x256xf32> to vector<8x256xbf16>
    %c0_6 = arith.constant 0 : index
    %c0_7 = arith.constant 0 : index
    %9 = vector.load %arg4[%c0_6, %c0_7] : memref<256x512xbf16, #tpu.memory_space<vmem>>, vector<256x512xbf16>
    %cst_8 = arith.constant dense<0.000000e+00> : vector<8x512xf32>
    %10 = tpu.matmul %8, %9, %cst_8 {dimension_numbers = #tpu.dot_dimension_numbers<[1], [0], [0], [1], [0, 0, 1, 1], [], []>} : vector<8x256xbf16>, vector<256x512xbf16>, vector<8x512xf32> -> vector<8x512xf32>
    %c0_9 = arith.constant 0 : index
    %c0_10 = arith.constant 0 : index
    %11 = vector.load %arg5[%c0_9, %c0_10] : memref<1x512xf32, #tpu.memory_space<vmem>>, vector<1x512xf32>
    %12 = vector.broadcast %11 : vector<1x512xf32> to vector<8x512xf32>
    %13 = arith.addf %10, %12 : vector<8x512xf32>
    %cst_11 = arith.constant 0.000000e+00 : f32
    %14 = vector.broadcast %cst_11 : f32 to vector<8x512xf32>
    %15 = arith.maximumf %13, %14 : vector<8x512xf32>
    %16 = arith.truncf %15 : vector<8x512xf32> to vector<8x512xbf16>
    %c0_12 = arith.constant 0 : index
    %c0_13 = arith.constant 0 : index
    %17 = vector.load %arg6[%c0_12, %c0_13] : memref<512x128xbf16, #tpu.memory_space<vmem>>, vector<512x128xbf16>
    %cst_14 = arith.constant dense<0.000000e+00> : vector<8x128xf32>
    %18 = tpu.matmul %16, %17, %cst_14 {dimension_numbers = #tpu.dot_dimension_numbers<[1], [0], [0], [1], [0, 0, 1, 1], [], []>} : vector<8x512xbf16>, vector<512x128xbf16>, vector<8x128xf32> -> vector<8x128xf32>
    %c0_15 = arith.constant 0 : index
    %c0_16 = arith.constant 0 : index
    %19 = vector.load %arg7[%c0_15, %c0_16] : memref<1x128xf32, #tpu.memory_space<vmem>>, vector<1x128xf32>
    %20 = vector.broadcast %19 : vector<1x128xf32> to vector<8x128xf32>
    %21 = arith.addf %18, %20 : vector<8x128xf32>
    %22 = math.tanh %21 : vector<8x128xf32>
    %c0_17 = arith.constant 0 : index
    %c0_18 = arith.constant 0 : index
    %23 = vector.load %arg8[%c0_17, %c0_18] : memref<8x128xf32, #tpu.memory_space<vmem>>, vector<8x128xf32>
    tpu.vector_store %arg8[%c0_17, %c0_18], %22 {strides = array<i32>} : memref<8x128xf32, #tpu.memory_space<vmem>>, vector<8x128xf32>,
    return
  }
  func.func @transform_0(%arg0: i32) -> (i32, i32) {
    %c0_i32 = arith.constant 0 : i32
    %c0_i32_0 = arith.constant 0 : i32
    return %arg0, %c0_i32 : i32, i32
  }
  func.func @transform_1(%arg0: i32) -> (i32, i32) {
    %c0_i32 = arith.constant 0 : i32
    %c0_i32_0 = arith.constant 0 : i32
    %c0_i32_1 = arith.constant 0 : i32
    return %c0_i32, %c0_i32_0 : i32, i32
  }
  func.func @transform_2(%arg0: i32) -> (i32, i32) {
    %c0_i32 = arith.constant 0 : i32
    %c0_i32_0 = arith.constant 0 : i32
    %c0_i32_1 = arith.constant 0 : i32
    return %c0_i32, %c0_i32_0 : i32, i32
  }
  func.func @transform_3(%arg0: i32) -> (i32, i32) {
    %c0_i32 = arith.constant 0 : i32
    %c0_i32_0 = arith.constant 0 : i32
    %c0_i32_1 = arith.constant 0 : i32
    return %c0_i32, %c0_i32_0 : i32, i32
  }
  func.func @transform_4(%arg0: i32) -> (i32, i32) {
    %c0_i32 = arith.constant 0 : i32
    %c0_i32_0 = arith.constant 0 : i32
    %c0_i32_1 = arith.constant 0 : i32
    return %c0_i32, %c0_i32_0 : i32, i32
  }
  func.func @transform_5(%arg0: i32) -> (i32, i32) {
    %c0_i32 = arith.constant 0 : i32
    %c0_i32_0 = arith.constant 0 : i32
    %c0_i32_1 = arith.constant 0 : i32
    return %c0_i32, %c0_i32_0 : i32, i32
  }
  func.func @transform_6(%arg0: i32) -> (i32, i32) {
    %c0_i32 = arith.constant 0 : i32
    %c0_i32_0 = arith.constant 0 : i32
    %c0_i32_1 = arith.constant 0 : i32
    return %c0_i32, %c0_i32_0 : i32, i32
  }
  func.func @transform_7(%arg0: i32) -> (i32, i32) {
    %c0_i32 = arith.constant 0 : i32
    %c0_i32_0 = arith.constant 0 : i32
    return %arg0, %c0_i32 : i32, i32
  }
}

</mosaic_0001>

<bundles_post_ra>
// kernel: generator_forward.1
= control target key start
LH: loop header
LB: loop body
LE: loop exit
PB: predicated region body
PF: predicated region fallthrough
CT: control target
= control target key end

     0   :  { %v1277_v2 = vmov 0   ;;  %vm65_vm0 = vcmask 261120   ;;  %s1657_s0 = inlined_call_operand.vmem [shape: bf16[8,32], index: 0, kind: input, shape index: {}]   ;;  %s1658_s1 = inlined_call_operand.vmem [shape: bf16[32,256], index: 1, kind: input, shape index: {}]   ;;  %s1659_s2 = inlined_call_operand.vmem [shape: f32[1,256], index: 2, kind: input, shape index: {}]   ;;  %s1660_s3 = inlined_call_operand.vmem [shape: bf16[256,512], index: 3, kind: input, shape index: {}]   ;;  %s1661_s4 = inlined_call_operand.vmem [shape: f32[1,512], index: 4, kind: input, shape index: {}]   ;;  %s1662_s5 = inlined_call_operand.vmem [shape: bf16[512,128], index: 5, kind: input, shape index: {}]   ;;  %s1663_s6 = inlined_call_operand.vmem [shape: f32[1,128], index: 6, kind: input, shape index: {}]   ;;  %s1664_s7 = inlined_call_operand.hbm [shape: f32[8,128], index: 7, kind: output, shape index: {}]  }
   0x1   :  { %v1117_v0 = vld [vmem:[%s1658_s1 + $0x4] ss:$8 sps:$4 sm:$0xff]   ;;  %v1119_v1 = vld [vmem:[%s1658_s1] ss:$8 sps:$4 sm:$0xff]   ;;  %101 = vmatprep.mubr.bf16.mxu0 %v1277_v2  ;;  %v1120_v3 = vld [vmem:[%s1658_s1 + $0x14] ss:$8 sps:$4 sm:$0xff]  }
   0x2   :  { %69 = vmatprep.subr.bf16.mxu0 %v1117_v0  ;;  %v1122_v4 = vld [vmem:[%s1658_s1 + $0x10] ss:$8 sps:$4 sm:$0xff]   ;;  %v1123_v5 = vld [vmem:[%s1660_s3 + $0x4] ss:$16 sps:$4 sm:$0xff]   ;;  %v28_v6 = vld [vmem:[%s1657_s0] sm:$0xf] }
   0x3   :  { %70 = vmatpush1.bf16.msra.mxu0 %v1119_v1  ;;  %520 = vmatprep.subr.bf16.mxu1 %v1123_v5  ;;  %v1127_v7 = vld [vmem:[%s1660_s3 + $0xc] ss:$16 sps:$4 sm:$0xff]   ;;  %v1128_v8 = vld [vmem:[%s1660_s3] ss:$16 sps:$4 sm:$0xff]   ;;  %v1129_v9 = vld [vmem:[%s1660_s3 + $0x24] ss:$16 sps:$4 sm:$0xff]  }
   0x4   :  { %71 = vmatprep.subr.bf16.mxu0 %v1120_v3  ;;  %v1125_v10 = vld [vmem:[%s1660_s3 + $0x8] ss:$16 sps:$4 sm:$0xff]   ;;  %521 = vmatpush1.bf16.msra.mxu1 %v1128_v8  ;;  %v1133_v11 = vld [vmem:[%s1660_s3 + $0x2c] ss:$16 sps:$4 sm:$0xff]   ;;  %v1134_v12 = vld [vmem:[%s1660_s3 + $0x20] ss:$16 sps:$4 sm:$0xff]  }
   0x5   :  { %522 = vmatprep.subr.bf16.mxu1 %v1129_v9  ;;  %v1135_v13 = vld [vmem:[%s1660_s3 + $0x44] ss:$16 sps:$4 sm:$0xff]   ;;  %v1131_v14 = vld [vmem:[%s1660_s3 + $0x28] ss:$16 sps:$4 sm:$0xff]   ;;  %v1139_v15 = vld [vmem:[%s1660_s3 + $0x4c] ss:$16 sps:$4 sm:$0xff]  }
   0x6   :  { %v1140_v16 = vld [vmem:[%s1660_s3 + $0x40] ss:$16 sps:$4 sm:$0xff]   ;;  %v1141_v17 = vld [vmem:[%s1660_s3 + $0x64] ss:$16 sps:$4 sm:$0xff]   ;;  %v1137_v18 = vld [vmem:[%s1660_s3 + $0x48] ss:$16 sps:$4 sm:$0xff]  }
   0x7   :  { %72 = vmatpush1.bf16.msra.mxu0 %v1122_v4  ;;  %v1145_v19 = vld [vmem:[%s1660_s3 + $0x6c] ss:$16 sps:$4 sm:$0xff]   ;;  %v1146_v20 = vld [vmem:[%s1660_s3 + $0x60] ss:$16 sps:$4 sm:$0xff]   ;;  %v1147_v21 = vld [vmem:[%s1660_s3 + $0x84] ss:$16 sps:$4 sm:$0xff]  }
   0x8   :  { %561 = vmatprep.subr.bf16.mxu0 %v1127_v7  ;;  %523 = vmatpush1.bf16.msra.mxu1 %v1134_v12  ;;  %v1143_v22 = vld [vmem:[%s1660_s3 + $0x68] ss:$16 sps:$4 sm:$0xff]   ;;  %v1151_v23 = vld [vmem:[%s1660_s3 + $0x8c] ss:$16 sps:$4 sm:$0xff]   ;;  %v1152_v24 = vld [vmem:[%s1660_s3 + $0x80] ss:$16 sps:$4 sm:$0xff]  }
   0x9   :  { %524 = vmatprep.subr.bf16.mxu1 %v1135_v13  ;;  %v1153_v25 = vld [vmem:[%s1660_s3 + $0xa4] ss:$16 sps:$4 sm:$0xff]   ;;  %v1149_v26 = vld [vmem:[%s1660_s3 + $0x88] ss:$16 sps:$4 sm:$0xff]   ;;  %v1157_v27 = vld [vmem:[%s1660_s3 + $0xac] ss:$16 sps:$4 sm:$0xff]  }
   0xa   :  { %973 = vmatmul.mubr.msk.bf16.vlgmr.msra.gmra.mrb[0].mxu0 %vm65_vm0, %v28_v6  ;;  %v1158_v28 = vld [vmem:[%s1660_s3 + $0xa0] ss:$16 sps:$4 sm:$0xff]   ;;  %v1159_v29 = vld [vmem:[%s1660_s3 + $0xc4] ss:$16 sps:$4 sm:$0xff]   ;;  %v1155_v30 = vld [vmem:[%s1660_s3 + $0xa8] ss:$16 sps:$4 sm:$0xff]  }
   0xb   :  { %562 = vmatpush1.bf16.msra.mxu0 %v1125_v10  ;;  %v1163_v31 = vld [vmem:[%s1660_s3 + $0xcc] ss:$16 sps:$4 sm:$0xff]   ;;  %v1164_v32 = vld [vmem:[%s1660_s3 + $0xc0] ss:$16 sps:$4 sm:$0xff]   ;;  %v1165_v33 = vld [vmem:[%s1660_s3 + $0xe4] ss:$16 sps:$4 sm:$0xff]  }
   0xc   :  { %563 = vmatprep.subr.bf16.mxu0 %v1133_v11  ;;  %525 = vmatpush1.bf16.msra.mxu1 %v1140_v16  ;;  %v1161_v34 = vld [vmem:[%s1660_s3 + $0xc8] ss:$16 sps:$4 sm:$0xff]   ;;  %v1169_v35 = vld [vmem:[%s1660_s3 + $0xec] ss:$16 sps:$4 sm:$0xff]   ;;  %v1170_v36 = vld [vmem:[%s1660_s3 + $0xe0] ss:$16 sps:$4 sm:$0xff]  }
   0xd   :  { %526 = vmatprep.subr.bf16.mxu1 %v1141_v17  ;;  %v1171_v37 = vld [vmem:[%s1660_s3 + $0x104] ss:$16 sps:$4 sm:$0xff]   ;;  %v1167_v38 = vld [vmem:[%s1660_s3 + $0xe8] ss:$16 sps:$4 sm:$0xff]   ;;  %v1175_v39 = vld [vmem:[%s1660_s3 + $0x10c] ss:$16 sps:$4 sm:$0xff]  }
   0xe   :  { %v1176_v40 = vld [vmem:[%s1660_s3 + $0x100] ss:$16 sps:$4 sm:$0xff]   ;;  %v1177_v41 = vld [vmem:[%s1660_s3 + $0x124] ss:$16 sps:$4 sm:$0xff]   ;;  %v1173_v42 = vld [vmem:[%s1660_s3 + $0x108] ss:$16 sps:$4 sm:$0xff]  }
   0xf   :  { %564 = vmatpush1.bf16.msra.mxu0 %v1131_v14  ;;  %v1182_v43 = vld [vmem:[%s1660_s3 + $0x120] ss:$16 sps:$4 sm:$0xff]   ;;  %v1181_v44 = vld [vmem:[%s1660_s3 + $0x12c] ss:$16 sps:$4 sm:$0xff]   ;;  %v1183_v45 = vld [vmem:[%s1660_s3 + $0x144] ss:$16 sps:$4 sm:$0xff]  }
  0x10   :  { %565 = vmatprep.subr.bf16.mxu0 %v1139_v15  ;;  %527 = vmatpush1.bf16.msra.mxu1 %v1146_v20  ;;  %v1179_v46 = vld [vmem:[%s1660_s3 + $0x128] ss:$16 sps:$4 sm:$0xff]   ;;  %v1188_v47 = vld [vmem:[%s1660_s3 + $0x140] ss:$16 sps:$4 sm:$0xff]   ;;  %v1187_v48 = vld [vmem:[%s1660_s3 + $0x14c] ss:$16 sps:$4 sm:$0xff]  }
  0x11   :  { %528 = vmatprep.subr.bf16.mxu1 %v1147_v21  ;;  %v1189_v49 = vld [vmem:[%s1660_s3 + $0x164] ss:$16 sps:$4 sm:$0xff]   ;;  %v1185_v50 = vld [vmem:[%s1660_s3 + $0x148] ss:$16 sps:$4 sm:$0xff]   ;;  %v1194_v51 = vld [vmem:[%s1660_s3 + $0x160] ss:$16 sps:$4 sm:$0xff]  }
  0x12   :  { %v1193_v52 = vld [vmem:[%s1660_s3 + $0x16c] ss:$16 sps:$4 sm:$0xff]   ;;  %v1195_v53 = vld [vmem:[%s1660_s3 + $0x184] ss:$16 sps:$4 sm:$0xff]   ;;  %v1191_v54 = vld [vmem:[%s1660_s3 + $0x168] ss:$16 sps:$4 sm:$0xff]  }
  0x13   :  { %566 = vmatpush1.bf16.msra.mxu0 %v1137_v18  ;;  %v1200_v55 = vld [vmem:[%s1660_s3 + $0x180] ss:$16 sps:$4 sm:$0xff]   ;;  %v1199_v56 = vld [vmem:[%s1660_s3 + $0x18c] ss:$16 sps:$4 sm:$0xff]   ;;  %v1201_v57 = vld [vmem:[%s1660_s3 + $0x1a4] ss:$16 sps:$4 sm:$0xff]  }
  0x14   :  { %567 = vmatprep.subr.bf16.mxu0 %v1145_v19  ;;  %529 = vmatpush1.bf16.msra.mxu1 %v1152_v24  ;;  %v1197_v58 = vld [vmem:[%s1660_s3 + $0x188] ss:$16 sps:$4 sm:$0xff]   ;;  %v1206_v59 = vld [vmem:[%s1660_s3 + $0x1a0] ss:$16 sps:$4 sm:$0xff]   ;;  %v1205_v60 = vld [vmem:[%s1660_s3 + $0x1ac] ss:$16 sps:$4 sm:$0xff]  }
  0x15   :  { %530 = vmatprep.subr.bf16.mxu1 %v1153_v25  ;;  %v1203_v61 = vld [vmem:[%s1660_s3 + $0x1a8] ss:$16 sps:$4 sm:$0xff]  }
  0x17   :  { %568 = vmatpush1.bf16.msra.mxu0 %v1143_v22 }
  0x18   :  { %569 = vmatprep.subr.bf16.mxu0 %v1151_v23  ;;  %531 = vmatpush1.bf16.msra.mxu1 %v1158_v28 }
  0x19   :  { %532 = vmatprep.subr.bf16.mxu1 %v1159_v29 }
  0x1b   :  { %570 = vmatpush1.bf16.msra.mxu0 %v1149_v26 }
  0x1c   :  { %571 = vmatprep.subr.bf16.mxu0 %v1157_v27  ;;  %533 = vmatpush1.bf16.msra.mxu1 %v1164_v32 }
  0x1d   :  { %534 = vmatprep.subr.bf16.mxu1 %v1165_v33 }
  0x1f   :  { %572 = vmatpush1.bf16.msra.mxu0 %v1155_v30 }
  0x20   :  { %573 = vmatprep.subr.bf16.mxu0 %v1163_v31  ;;  %535 = vmatpush1.bf16.msra.mxu1 %v1170_v36 }
  0x21   :  { %536 = vmatprep.subr.bf16.mxu1 %v1171_v37 }
  0x23   :  { %574 = vmatpush1.bf16.msra.mxu0 %v1161_v34 }
  0x24   :  { %575 = vmatprep.subr.bf16.mxu0 %v1169_v35  ;;  %537 = vmatpush1.bf16.msra.mxu1 %v1176_v40 }
  0x25   :  { %538 = vmatprep.subr.bf16.mxu1 %v1177_v41 }
  0x27   :  { %576 = vmatpush1.bf16.msra.mxu0 %v1167_v38 }
  0x28   :  { %577 = vmatprep.subr.bf16.mxu0 %v1175_v39  ;;  %539 = vmatpush1.bf16.msra.mxu1 %v1182_v43 }
  0x29   :  { %540 = vmatprep.subr.bf16.mxu1 %v1183_v45 }
  0x2b   :  { %578 = vmatpush1.bf16.msra.mxu0 %v1173_v42 }
  0x2c   :  { %579 = vmatprep.subr.bf16.mxu0 %v1181_v44  ;;  %541 = vmatpush1.bf16.msra.mxu1 %v1188_v47 }
  0x2d   :  { %542 = vmatprep.subr.bf16.mxu1 %v1189_v49 }
  0x2f   :  { %580 = vmatpush1.bf16.msra.mxu0 %v1179_v46 }
  0x30   :  { %581 = vmatprep.subr.bf16.mxu0 %v1187_v48  ;;  %543 = vmatpush1.bf16.msra.mxu1 %v1194_v51 }
  0x31   :  { %544 = vmatprep.subr.bf16.mxu1 %v1195_v53 }
  0x33   :  { %582 = vmatpush1.bf16.msra.mxu0 %v1185_v50 }
  0x34   :  { %583 = vmatprep.subr.bf16.mxu0 %v1193_v52  ;;  %545 = vmatpush1.bf16.msra.mxu1 %v1200_v55 }
  0x35   :  { %546 = vmatprep.subr.bf16.mxu1 %v1201_v57 }
  0x37   :  { %584 = vmatpush1.bf16.msra.mxu0 %v1191_v54 }
  0x38   :  { %585 = vmatprep.subr.bf16.mxu0 %v1199_v56  ;;  %547 = vmatpush1.bf16.msra.mxu1 %v1206_v59 }
  0x3b   :  { %586 = vmatpush1.bf16.msra.mxu0 %v1197_v58 }
  0x3c   :  { %587 = vmatprep.subr.bf16.mxu0 %v1205_v60 }
  0x3f   :  { %588 = vmatpush1.bf16.msra.mxu0 %v1203_v61 }
  0x40   :  { %12 = vsyncpa [#allocation3], 0  ;;  %v1207_v62 = vld [vmem:[%s1660_s3 + $0x1c4] ss:$16 sps:$4 sm:$0xff]   ;;  %v1211_v63 = vld [vmem:[%s1660_s3 + $0x1cc] ss:$16 sps:$4 sm:$0xff]   ;;  %v35_v8 = vlaneseq }
  0x41   :  { %v1209_v0 = vld [vmem:[%s1660_s3 + $0x1c8] ss:$16 sps:$4 sm:$0xff]   ;;  %v1212_v1 = vld [vmem:[%s1660_s3 + $0x1c0] ss:$16 sps:$4 sm:$0xff]   ;;  %548 = vmatprep.subr.bf16.mxu1 %v1207_v62  ;;  %589 = vmatprep.subr.bf16.mxu0 %v1211_v63  ;;  %v1213_v2 = vld [vmem:[%s1660_s3 + $0x1e4] ss:$16 sps:$4 sm:$0xff]  }
  0x42   :  { %549 = vmatpush1.bf16.msra.mxu1 %v1212_v1  ;;  %v1217_v3 = vld [vmem:[%s1660_s3 + $0x1ec] ss:$16 sps:$4 sm:$0xff]   ;;  %v1215_v4 = vld [vmem:[%s1660_s3 + $0x1e8] ss:$16 sps:$4 sm:$0xff]   ;;  %v1218_v5 = vld [vmem:[%s1660_s3 + $0x1e0] ss:$16 sps:$4 sm:$0xff]  }
  0x43   :  { %590 = vmatpush1.bf16.msra.mxu0 %v1209_v0  ;;  %550 = vmatprep.subr.bf16.mxu1 %v1213_v2  ;;  %v1219_v6 = vld [vmem:[%s1662_s5 + $0x40] sm:$0xff]   ;;  %v1532_v9 = vshrl.u32 %v35_v8, 7  ;;  %v1223_v27 = vld [vmem:[%s1662_s5 + $0x48] sm:$0xff]   ;;  %v1227_v31 = vld [vmem:[%s1662_s5 + $0x50] sm:$0xff]   ;;  %s1278_s24 = smov [#allocation2]  }
  0x44   :  { %591 = vmatprep.subr.bf16.mxu0 %v1217_v3  ;;  %v1220_v7 = vld [vmem:[%s1662_s5 + $0xc0] sm:$0xff]   ;;  %v1224_v28 = vld [vmem:[%s1662_s5 + $0xc8] sm:$0xff]   ;;  %v1228_v32 = vld [vmem:[%s1662_s5 + $0xd0] sm:$0xff]   ;;  %s961_s25 = sshll.u32 %s1278_s24, 4  ;;  %s962_s25 = int_to_ptr.vmem [resolvable:$true] %s961_s25 }
  0x45   :  { %v37_v10 = vsub.s32 0, %v1532_v9  ;;  %v33_v11 = vld [vmem:[%s1659_s2] sm:$0x3]  ;;  %v41_v12 = vsub.s32 1, %v1532_v9  ;;  %v1225_v29 = vld [vmem:[%s1662_s5 + $0x8] sm:$0xff]   ;;  %v1229_v33 = vld [vmem:[%s1662_s5 + $0x10] sm:$0xff]   ;;  %p1258_p1 = scmp.lt.s32.totalorder %s962_s25, %s962_s25 }
  0x46   :  { %551 = vmatpush1.bf16.msra.mxu1 %v1218_v5  ;;  %v1221_v24 = vld [vmem:[%s1662_s5] sm:$0xff]   ;;  %v1226_v30 = vld [vmem:[%s1662_s5 + $0x88] sm:$0xff]   ;;  %v1230_v34 = vld [vmem:[%s1662_s5 + $0x90] sm:$0xff]   ;;  %v190_v55 = vsub.s32 2, %v1532_v9  ;;  %v194_v57 = vsub.s32 3, %v1532_v9  ;;  %s1253_s26 = scalar_lea.vmem %s962_s25, 128 }
  0x47   :  { %592 = vmatpush1.bf16.msra.mxu0 %v1215_v4  ;;  %1071 = vmatprep.subr.bf16.mxu1 %v1219_v6  ;;  %v38_v13 = vrot.slane %v33_v11, %v37_v10  ;;  %v42_v14 = vrot.slane %v33_v11, %v41_v12  ;;  %v1222_v25 = vld [vmem:[%s1662_s5 + $0x80] sm:$0xff]   ;;  %v1231_v35 = vld [vmem:[%s1662_s5 + $0x58] sm:$0xff]   ;;  %v1239_v43 = vld [vmem:[%s1662_s5 + $0x68] sm:$0xff]   ;;  %p1254_p0 = scmp.ne.s32.totalorder %s962_s25, %s1253_s26  ;;  %p1259_p2 = scmp.lt.s32.totalorder %s1253_s26, %s1253_s26 }
  0x48   :  { %1093 = vmatprep.subr.bf16.mxu0 %v1220_v7  ;;  %v1232_v36 = vld [vmem:[%s1662_s5 + $0xd8] sm:$0xff]   ;;  %v1235_v39 = vld [vmem:[%s1662_s5 + $0x60] sm:$0xff]   ;;  %v1240_v44 = vld [vmem:[%s1662_s5 + $0xe8] sm:$0xff]  }
  0x49   :  { %v1233_v37 = vld [vmem:[%s1662_s5 + $0x18] sm:$0xff]   ;;  %v1236_v40 = vld [vmem:[%s1662_s5 + $0xe0] sm:$0xff]   ;;  %v1241_v45 = vld [vmem:[%s1662_s5 + $0x28] sm:$0xff]   ;;  %p1260_p3 = por %p1259_p2, %p1258_p1 }
  0x4a   :  { %v1234_v38 = vld [vmem:[%s1662_s5 + $0x98] sm:$0xff]   ;;  %v1237_v41 = vld [vmem:[%s1662_s5 + $0x20] sm:$0xff]   ;;  %v1242_v46 = vld [vmem:[%s1662_s5 + $0xa8] sm:$0xff]  }
  0x4b   :  { %v1238_v42 = vld [vmem:[%s1662_s5 + $0xa0] sm:$0xff]   ;;  %v1243_v47 = vld [vmem:[%s1662_s5 + $0x70] sm:$0xff]   ;;  %v1247_v51 = vld [vmem:[%s1662_s5 + $0x78] sm:$0xff]   ;;  %p1261_p4 = pnand %p1260_p3, %p1254_p0 }
  0x4c   :  { %v1244_v48 = vld [vmem:[%s1662_s5 + $0xf0] sm:$0xff]   ;;  %v1248_v52 = vld [vmem:[%s1662_s5 + $0xf8] sm:$0xff]   ;;  %v178_v56 = vld [vmem:[%s1661_s4] sm:$0xf] }
  0x4d   :  { %v1245_v49 = vld [vmem:[%s1662_s5 + $0x30] sm:$0xff]   ;;  %v1249_v53 = vld [vmem:[%s1662_s5 + $0x38] sm:$0xff]   ;;  %v183_v58 = vrot.slane %v178_v56, %v37_v10  ;;  %v191_v59 = vrot.slane %v178_v56, %v190_v55  ;;  %v187_v60 = vrot.slane %v178_v56, %v41_v12  ;;  %v195_v61 = vrot.slane %v178_v56, %v194_v57 }
  0x4e   :  { %v1246_v50 = vld [vmem:[%s1662_s5 + $0xb0] sm:$0xff]   ;;  %v1250_v54 = vld [vmem:[%s1662_s5 + $0xb8] sm:$0xff]  }
  0xdd   :  { %v103_v15 = vpop.f32.mrb[0].mxu0 }
  0xde   :  { %v104_v16 = vadd.f32 %v103_v15, %v38_v13  ;;  %v105_v17 = vpop.f32.mrb[1].mxu0 }
  0xdf   :  { %v106_v18 = vadd.f32 %v105_v17, %v42_v14  ;;  %v107_v19 = vpop.f32.mrb[2].mxu0 }
  0xe0   :  { %v110_v20 = vmax.f32 %v104_v16, 0.0  ;;  %v108_v21 = vpop.f32.mrb[3].mxu0 }
  0xe1   :  { %v111_v22 = vmax.f32 %v106_v18, 0.0 }
  0xe2   :  { %v112_v26 = vpack.c.bf16 %v110_v20, %v110_v20  ;;  %v1038_v20 = vld [vmem:[%s1663_s6] ss:$0 sm:$0xff] }
  0xe3   :  { %v113_v23 = vpack.c.bf16 %v111_v22, %v111_v22 }
  0xe5   :  { %552 = vmatprep.mubr.bf16.mxu1 %v113_v23  ;;  %593 = vmatprep.mubr.bf16.mxu0 %v113_v23 }
  0xe6   :  { %553 = vmatmul.mubr.bf16.vlgmr.msra.gmra.mrb[0].mxu1 %v112_v26  ;;  %594 = vmatmul.mubr.bf16.vlgmr.msra.gmra.mrb[4].mxu0 %v112_v26 }
  0xe7   :  { %1072 = vmatpush3.bf16.msra.mxu1 %v1221_v24  ;;  %1094 = vmatpush3.bf16.msra.mxu0 %v1222_v25 }
  0xe8   :  { %1073 = vmatprep.subr.bf16.mxu1 %v1223_v27  ;;  %1095 = vmatprep.subr.bf16.mxu0 %v1224_v28 }
  0xeb   :  { %1074 = vmatpush3.bf16.msra.mxu1 %v1225_v29  ;;  %1096 = vmatpush3.bf16.msra.mxu0 %v1226_v30 }
  0xec   :  { %1075 = vmatprep.subr.bf16.mxu1 %v1227_v31  ;;  %1097 = vmatprep.subr.bf16.mxu0 %v1228_v32 }
  0xef   :  { %1076 = vmatpush3.bf16.msra.mxu1 %v1229_v33  ;;  %1098 = vmatpush3.bf16.msra.mxu0 %v1230_v34 }
  0xf0   :  { %1077 = vmatprep.subr.bf16.mxu1 %v1231_v35  ;;  %1099 = vmatprep.subr.bf16.mxu0 %v1232_v36 }
  0xf3   :  { %1078 = vmatpush3.bf16.msra.mxu1 %v1233_v37  ;;  %1100 = vmatpush3.bf16.msra.mxu0 %v1234_v38 }
  0xf4   :  { %1079 = vmatprep.subr.bf16.mxu1 %v1235_v39  ;;  %1101 = vmatprep.subr.bf16.mxu0 %v1236_v40 }
  0xf7   :  { %1080 = vmatpush3.bf16.msra.mxu1 %v1237_v41  ;;  %1102 = vmatpush3.bf16.msra.mxu0 %v1238_v42 }
  0xf8   :  { %1081 = vmatprep.subr.bf16.mxu1 %v1239_v43  ;;  %1103 = vmatprep.subr.bf16.mxu0 %v1240_v44 }
  0xfb   :  { %1082 = vmatpush3.bf16.msra.mxu1 %v1241_v45  ;;  %1104 = vmatpush3.bf16.msra.mxu0 %v1242_v46 }
  0xfc   :  { %1083 = vmatprep.subr.bf16.mxu1 %v1243_v47  ;;  %1105 = vmatprep.subr.bf16.mxu0 %v1244_v48 }
  0xff   :  { %1084 = vmatpush3.bf16.msra.mxu1 %v1245_v49  ;;  %1106 = vmatpush3.bf16.msra.mxu0 %v1246_v50 }
 0x100   :  { %1085 = vmatprep.subr.bf16.mxu1 %v1247_v51  ;;  %1107 = vmatprep.subr.bf16.mxu0 %v1248_v52 }
 0x103   :  { %1086 = vmatpush3.bf16.msra.mxu1 %v1249_v53  ;;  %1108 = vmatpush3.bf16.msra.mxu0 %v1250_v54 }
 0x1b9   :  { %v554_v62 = vpop.f32.mrb[0].mxu1  ;;  %v595_v63 = vpop.f32.mrb[4].mxu0 }
 0x1ba   :  { %v555_v0 = vadd.f32 %v554_v62, %v183_v58  ;;  %v596_v1 = vadd.f32 %v595_v63, %v191_v59  ;;  %v556_v2 = vpop.f32.mrb[1].mxu1  ;;  %v597_v3 = vpop.f32.mrb[5].mxu0 }
 0x1bb   :  { %v557_v4 = vadd.f32 %v556_v2, %v187_v60  ;;  %v598_v5 = vadd.f32 %v597_v3, %v195_v61  ;;  %v558_v6 = vpop.f32.mrb[2].mxu1  ;;  %v599_v7 = vpop.f32.mrb[6].mxu0 }
 0x1bc   :  { %v602_v8 = vmax.f32 %v555_v0, 0.0  ;;  %v604_v11 = vmax.f32 %v596_v1, 0.0  ;;  %v559_v13 = vpop.f32.mrb[3].mxu1  ;;  %v600_v14 = vpop.f32.mrb[7].mxu0 }
 0x1bd   :  { %v603_v10 = vmax.f32 %v557_v4, 0.0  ;;  %v605_v15 = vmax.f32 %v598_v5, 0.0 }
 0x1be   :  { %v606_v12 = vpack.c.bf16 %v602_v8, %v602_v8  ;;  %v608_v17 = vpack.c.bf16 %v604_v11, %v604_v11 }
 0x1bf   :  { %v607_v16 = vpack.c.bf16 %v603_v10, %v603_v10  ;;  %v609_v9 = vpack.c.bf16 %v605_v15, %v605_v15 }
 0x1c1   :  { %905 = vmatprep.mubr.bf16.mxu1 %v607_v16  ;;  %945 = vmatprep.mubr.bf16.mxu0 %v609_v9 }
 0x1c2   :  { %906 = vmatmul.mubr.bf16.vlgmr.msra.gmra.mrb[4].mxu1 %v606_v12  ;;  %946 = vmatmul.mubr.bf16.vlgmr.msra.gmra.mrb[8].mxu0 %v608_v17 }
 0x295   :  { %v1087_v18 = vpop.f32.mrb[4].mxu1  ;;  %v1109_v19 = vpop.f32.mrb[8].mxu0 }
 0x296   :  { %v1088_v21 = vpop.f32.mrb[5].mxu1  ;;  %v1110_v22 = vpop.f32.mrb[9].mxu0 }
 0x297   :  { %v1089_v23 = vadd.f32 %v1088_v21, %v1087_v18  ;;  %v1111_v24 = vadd.f32 %v1110_v22, %v1109_v19  ;;  %v1090_v25 = vpop.f32.mrb[6].mxu1  ;;  %v1112_v26 = vpop.f32.mrb[10].mxu0 }
 0x298   :  { %v1091_v27 = vpop.f32.mrb[7].mxu1  ;;  %v1113_v28 = vpop.f32.mrb[11].mxu0 }
 0x299   :  { %v908_v29 = vadd.f32 %v1089_v23, %v1038_v20 }
 0x29b   :  { %v948_v30 = vadd.f32 %v1111_v24, %v908_v29 }
 0x29d   :  { %1251 = vtanh.f32 %v948_v30 }
 0x2a7   :  { %v1252_v31 = vpop.eup %1251 }
 0x2a8   :  { %954 = vst [vmem:[#allocation2] sm:$0xff] %v1252_v31 }
 0x2a9   :  { %1264 = shalt.err (!%p1261_p4)
}
 0x2aa   :  { %s1265_s28 = scalar_lea.hbm %s1664_s7, 128 }
 0x2ab   :  { %p1266_p5 = scmp.ne.s32.totalorder %s1664_s7, %s1265_s28  ;;  %p1269_p6 = scmp.lt.u32.totalorder %s1265_s28, %s1664_s7 }
 0x2ad   :  { %p1271_p7 = pnand %p1269_p6, %p1266_p5 }
 0x2af   :  { %1274 = shalt.err (!%p1271_p7)
}
 0x2b0   :  { %964 = dma.vmem_to_hbm [thread:$0]  %s962_s25, 128, %s1664_s7, [#allocation3]  }
 0x2b1   :  { %1275 = dma.done.wait [#allocation3], 128  }
 0x2b2   :  { %1276 = vsyncadd [#allocation3], 4294967168 }
 0x2b3   :  { %968 = vsyncpa [#allocation3], 1 }

</bundles_post_ra>
